<compile_context>
chip_gen: v6e
topology: v6e:2x2x1
jax: 0.10.0
libtpu: 0.0.40
codegen_flags: <defaults>
</compile_context>

<pallas_src>
import functools
import math
import numpy as np

import jax
import jax.numpy as jnp
from jax import lax
from jax.experimental import pallas as pl
from jax.experimental.pallas import tpu as pltpu


# -----------------------------------------------------------------------------
# deterministic constants (mirror fspecial / dct2d / gamma-table of the reference)
# -----------------------------------------------------------------------------
def _fspecial_gauss3(sigma=0.5):
    ax = np.arange(-1.0, 2.0)
    yy, xx = np.meshgrid(ax, ax, indexing="ij")
    h = np.exp(-(xx * xx + yy * yy) / (2.0 * sigma * sigma))
    h[h < np.finfo(h.dtype).eps * h.max()] = 0
    h = h / h.sum()
    return h


_GK = _fspecial_gauss3()
# the 3x3 sigma=0.5 kernel is exactly symmetric: 4 equal corners, 4 equal edges.
_GK_CORNER = float(_GK[0, 0])
_GK_EDGE = float(_GK[0, 1])
_GK_CENTER = float(_GK[1, 1])


def _dct_matrix(n=7):
    k = np.arange(n)[:, None]
    m = np.arange(n)[None, :]
    d = np.sqrt(2.0 / n) * np.cos(np.pi * (2 * m + 1) * k / (2 * n))
    d[0, :] *= 1.0 / np.sqrt(2.0)
    return d


_D7 = _dct_matrix(7)
# vec(D X D^T) = vec(X) @ kron(D, D)^T (row-major flattening); pad to 128 lanes
# so the fused kernel's matmul output tile is lane-dense (extra MXU cols free).
_DCT_WPAD = np.zeros((49, 128), np.float32)
_DCT_WPAD[:, :49] = np.kron(_D7, _D7).T.astype(np.float32)


def _reduction_matrix():
    """(128,128) mask-reduction matrix: col0 = 48 AC coeffs, cols1..3 = the three
    oriented 16-coefficient subsets of the reference (flat index = 7*row+col)."""
    rm = np.zeros((128, 128), np.float32)
    rm[1:49, 0] = 1.0
    f1 = list(range(1, 7)) + list(range(9, 14)) + list(range(18, 21)) + [26, 27]
    f2 = [8, 16, 17, 23, 24, 25, 31, 32, 33, 34, 39, 40, 41, 46, 47, 48]
    f3 = [7, 14, 21, 28, 35, 42, 15, 22, 29, 36, 43, 30, 37, 44, 38, 45]
    rm[f1, 1] = 1.0
    rm[f2, 2] = 1.0
    rm[f3, 3] = 1.0
    return rm


_RED_MAT = _reduction_matrix()

# gamma lookup table + midpoints between consecutive r-table entries.
# r(gamma) is strictly monotone decreasing on [0.03, 10], so
#   argmin_k |rho - r[k]| == #{k : midpoint[k] > rho}
#                         == len(mid) - searchsorted(ascending mid, rho, 'right')
# (the strict '>' reproduces torch argmin's first-index tie-break).
_GAMMA_TAB = np.arange(0.03, 10.0 + 0.001, 0.001).astype(np.float64)
_RTAB = np.exp(np.array([math.lgamma(1.0 / g) + math.lgamma(3.0 / g)
                         - 2.0 * math.lgamma(2.0 / g) for g in _GAMMA_TAB]))
_MID_ASC = np.ascontiguousarray((0.5 * (_RTAB[:-1] + _RTAB[1:]))[::-1]).astype(np.float32)
_GAMMA_TAB_F32 = _GAMMA_TAB.astype(np.float32)

_T_ROWS = 1024     # rows (7x7 blocks) per grid step in the fused DCT/stats kernel


# -----------------------------------------------------------------------------
# Pallas kernel 1: fused 3x3 gaussian blur + stride-2 decimation (one pyramid level)
# -----------------------------------------------------------------------------
def _gauss_down_kernel(ee_ref, eo_ref, oe_ref, oo_ref, o_ref, *, mask_last_col):
    """Inputs are the 4 row/col parities of the (zero-padded) plane, folded to
    (planes*S, Wp) 2-D blocks.  out[io,jo] = sum_{a,b} k[a,b]*x[2io+a, 2jo+b]."""
    A = ee_ref[...]          # x[even rows, even cols]
    Bm = eo_ref[...]         # x[even rows, odd  cols]
    Cm = oe_ref[...]         # x[odd  rows, even cols]
    Dm = oo_ref[...]         # x[odd  rows, odd  cols]
    rows, wp = A.shape

    # column (+1) shifts and row (+1) shifts all on the XLU (no VMEM copies).
    AL = pltpu.roll(A, wp - 1, 1)          # A[:, j+1]
    CL = pltpu.roll(Cm, wp - 1, 1)         # C[:, j+1]
    AU = pltpu.roll(A, rows - 1, 0)        # A[i+1, :]
    BU = pltpu.roll(Bm, rows - 1, 0)       # B[i+1, :]
    AUL = pltpu.roll(AU, wp - 1, 1)        # A[i+1, j+1]

    if mask_last_col:
        # the trimmed layout drops the (always-zero) border column; zero the
        # lane-roll wrap so the last output column stays correct.
        lane = lax.broadcasted_iota(jnp.int32, A.shape, 1)
        cmask = (lane < (wp - 1)).astype(A.dtype)
        AL = AL * cmask
        CL = CL * cmask
        AUL = AUL * cmask

    # symmetric gaussian: group equal taps (3 muls + 10 adds).
    o_ref[...] = (_GK_CORNER * ((A + AL) + (AU + AUL)) +
                  _GK_EDGE * ((Bm + Cm) + (CL + BU)) +
                  _GK_CENTER * Dm)


def gauss_pyr_down_pallas(x):
    """One gaussian-pyramid level: 3x3 gauss blur ('same' zero pad) then take
    rows/cols 1::2.  Decimation is fused into the kernel.  x: (B, C, H, W)."""
    B, C, H, W = x.shape
    Ho, Wo = H // 2, W // 2
    # Even-parity planes need rows 0..Ho and cols 0..Wo.  When Wo is already a
    # multiple of 128 and W is even, col Wo is pure zero padding: drop it and
    # mask the lane-roll wrap instead (e.g. W=512 -> Wp=256 instead of 384).
    trim_cols = (Wo % 128 == 0) and (W % 2 == 0) and (Wo > 0)
    Ws = Wo if trim_cols else Wo + 1
    Hs = Ho + 1
    S = ((Hs + 7) // 8) * 8               # sublane-aligned rows per plane
    Wp = ((Ws + 127) // 128) * 128        # lane-aligned cols per plane
    # cross-plane contamination of the sublane roll lands only in rows >= Ho,
    # which are discarded below; this relies on S >= Ho + 1.
    assert S >= Ho + 1
    BC = B * C

    xpad = jnp.pad(x.reshape(BC, H, W).astype(jnp.float32),
                   ((0, 0), (0, 2 * S - H), (0, 2 * Wp - W)))
    # 4 parity sub-images (done once in XLA); kernel only sees contiguous blocks
    xee = xpad[:, 0::2, 0::2].reshape(BC * S, Wp)
    xeo = xpad[:, 0::2, 1::2].reshape(BC * S, Wp)
    xoe = xpad[:, 1::2, 0::2].reshape(BC * S, Wp)
    xoo = xpad[:, 1::2, 1::2].reshape(BC * S, Wp)

    # planes per grid step: 4 inputs + 1 output, double buffered -> ~10 blocks;
    # cap each block at 1.5 MiB so the total stays under the smallest default
    # scoped-VMEM budget (16 MiB on v5e) without a vmem_limit override.
    plane_bytes = S * Wp * 4
    P = max(1, min(BC, (3 << 19) // max(plane_bytes, 1)))
    # TODO(synk): planes larger than the per-block VMEM budget would need halo tiling.
    BCp = ((BC + P - 1) // P) * P
    if BCp != BC:
        extra = (BCp - BC) * S
        xee = jnp.pad(xee, ((0, extra), (0, 0)))
        xeo = jnp.pad(xeo, ((0, extra), (0, 0)))
        xoe = jnp.pad(xoe, ((0, extra), (0, 0)))
        xoo = jnp.pad(xoo, ((0, extra), (0, 0)))

    blk = (P * S, Wp)
    kern = functools.partial(_gauss_down_kernel, mask_last_col=trim_cols)
    out = pl.pallas_call(
        kern,
        out_shape=jax.ShapeDtypeStruct((BCp * S, Wp), jnp.float32),
        grid=(BCp // P,),
        in_specs=[pl.BlockSpec(blk, lambda i: (i, 0)),
                  pl.BlockSpec(blk, lambda i: (i, 0)),
                  pl.BlockSpec(blk, lambda i: (i, 0)),
                  pl.BlockSpec(blk, lambda i: (i, 0))],
        out_specs=pl.BlockSpec(blk, lambda i: (i, 0)),
        compiler_params=pltpu.CompilerParams(dimension_semantics=("parallel",)),
    )(xee, xeo, xoe, xoo)

    out = out.reshape(BCp, S, Wp)[:BC, :Ho, :Wo]
    return out.reshape(B, C, Ho, Wo)


# -----------------------------------------------------------------------------
# Pallas kernel 2: fused 7x7 block DCT + per-block statistics
# -----------------------------------------------------------------------------
def _dct_stats_kernel(x_ref, w_ref, rm_ref, o_ref):
    """x_ref: (T,49) flattened patches; w_ref: (49,128) lane-padded 2-D DCT
    matrix; rm_ref: (128,128) mask-reduction matrix (cols 0..3).
    Per row emit [rho_gamma, coeff_var, oriented_rho, 0] (single (T,4) store)."""
    c = jnp.dot(x_ref[...], w_ref[...], preferred_element_type=jnp.float32)   # (T,128)
    rm = rm_ref[...]
    abs_c = jnp.abs(c)
    c2 = c * c

    # masked lane sums on the (otherwise idle) MXU instead of XLU reductions.
    s1 = jnp.dot(c, rm, preferred_element_type=jnp.float32)        # sum c    * mask
    s2 = jnp.dot(c2, rm, preferred_element_type=jnp.float32)       # sum c^2  * mask
    sa = jnp.dot(abs_c, rm, preferred_element_type=jnp.float32)    # sum |c|  * mask

    # --- gamma_gen_gauss rho on the 48 AC coefficients (torch.var unbiased -> /47)
    mean = s1[:, 0:1] * (1.0 / 48.0)
    sd = jnp.dot(jnp.abs(c - mean), rm, preferred_element_type=jnp.float32)
    var = jnp.maximum((s2[:, 0:1] - 48.0 * mean * mean) * (1.0 / 47.0), 0.0)
    mean_abs2 = (sd[:, 0:1] * (1.0 / 48.0)) ** 2
    rho_g = var / (mean_abs2 + 1e-7)

    # --- coeff_var_dct: std(|AC|, unbiased=True) / (mean(|AC|) + 1e-7)
    ma = sa[:, 0:1] * (1.0 / 48.0)
    va = jnp.maximum((s2[:, 0:1] - 48.0 * ma * ma) * (1.0 / 47.0), 0.0)
    cv = jnp.sqrt(va) / (ma + 1e-7)

    # --- oriented_dct_rho: three 16-coeff subsets (eps 1e-8); var over 3 -> /2
    gs = []
    for k in range(1, 4):
        mk = sa[:, k:k + 1] * (1.0 / 16.0)
        vk = jnp.maximum((s2[:, k:k + 1] - 16.0 * mk * mk) * (1.0 / 15.0), 0.0)
        gs.append(jnp.sqrt(vk) / (mk + 1e-8))
    gm = (gs[0] + gs[1] + gs[2]) * (1.0 / 3.0)
    orho = ((gs[0] - gm) ** 2 + (gs[1] - gm) ** 2 + (gs[2] - gm) ** 2) * 0.5

    o_ref[...] = jnp.concatenate([rho_g, cv, orho, jnp.zeros_like(rho_g)], axis=-1)


def dct_stats_pallas(rows):
    """rows: (R, 49) flattened 7x7 patches.
    Returns (rho_gamma, coeff_var, oriented_rho) each of shape (R,)."""
    R = rows.shape[0]
    T = min(_T_ROWS, ((R + 7) // 8) * 8)
    Rp = ((R + T - 1) // T) * T
    xp = jnp.pad(rows.astype(jnp.float32), ((0, Rp - R), (0, 0)))
    out = pl.pallas_call(
        _dct_stats_kernel,
        out_shape=jax.ShapeDtypeStruct((Rp, 4), jnp.float32),
        grid=(Rp // T,),
        in_specs=[pl.BlockSpec((T, 49), lambda i: (i, 0)),
                  pl.BlockSpec((49, 128), lambda i: (0, 0)),
                  pl.BlockSpec((128, 128), lambda i: (0, 0))],
        out_specs=pl.BlockSpec((T, 4), lambda i: (i, 0)),
        compiler_params=pltpu.CompilerParams(dimension_semantics=("parallel",)),
    )(xp, jnp.asarray(_DCT_WPAD), jnp.asarray(_RED_MAT))
    return out[:R, 0], out[:R, 1], out[:R, 2]


# -----------------------------------------------------------------------------
# plain-JAX glue (patch extraction, sorting, percentile means, im2col)
# -----------------------------------------------------------------------------
def extract_2d_patches(x, k=7, stride=3):
    """'same'(zero)-padded patch extraction -> (B, n_patches, C, k, k)."""
    B, C, H, W = x.shape
    h2, w2 = math.ceil(H / stride), math.ceil(W / stride)
    pad_row = (h2 - 1) * stride + k - H
    pad_col = (w2 - 1) * stride + k - W
    pt, pb = pad_row // 2, pad_row - pad_row // 2
    pL, pR = pad_col // 2, pad_col - pad_col // 2
    xp = jnp.pad(x, ((0, 0), (0, 0), (pt, pb), (pL, pR)))
    ridx = (np.arange(h2) * stride)[:, None] + np.arange(k)[None, :]
    cidx = (np.arange(w2) * stride)[:, None] + np.arange(k)[None, :]
    p = xp[:, :, ridx, :]                 # (B, C, nh, k, Wp)
    p = p[:, :, :, :, cidx]               # (B, C, nh, k, nw, k)
    p = p.transpose(0, 2, 4, 1, 3, 5).reshape(B, h2 * w2, C, k, k)
    return p


def block_dct_feat(im, gamma_tab, mid_asc):
    """Local frequency (block-DCT) features for one pyramid level."""
    B = im.shape[0]
    blocks = extract_2d_patches(im, 7, 3)                 # (B, N, C, 7, 7)
    N, C = blocks.shape[1], blocks.shape[2]
    rows = blocks.reshape(-1, 49)

    rho_rows, cv_rows, or_rows = dct_stats_pallas(rows)
    # gamma-table lookup (strictly decreasing r-table -> single searchsorted).
    idx = mid_asc.shape[0] - jnp.searchsorted(mid_asc, rho_rows, side="right")
    gamma_rows = jnp.take(gamma_tab, idx)

    g = jnp.sort(gamma_rows.reshape(B, N * C), axis=-1)
    cv = jnp.sort(cv_rows.reshape(B, N * C), axis=-1)
    rho = jnp.sort(or_rows.reshape(B, N * C), axis=-1)

    p10_g = g[:, :math.ceil(0.1 * g.shape[-1]) + 1].mean(-1)
    p100_g = g.mean(-1)
    p10_cv = cv[:, math.floor(0.9 * cv.shape[-1]):].mean(-1)
    p100_cv = cv.mean(-1)
    p10_or = rho[:, math.floor(0.9 * rho.shape[-1]):].mean(-1)
    p100_or = rho.mean(-1)
    return jnp.stack([p10_g, p100_g, p10_cv, p100_cv, p10_or, p100_or], axis=1)


def im2col_distinct(x, k=5):
    B, C, H, W = x.shape
    h2, w2 = math.ceil(H / k), math.ceil(W / k)
    xp = jnp.pad(x, ((0, 0), (0, 0), (0, h2 * k - H), (0, w2 * k - W)))
    xp = xp.reshape(B, C, h2, k, w2, k)
    cols = xp.transpose(0, 1, 3, 5, 2, 4).reshape(B, C * k * k, h2 * w2)
    return cols


# -----------------------------------------------------------------------------
# host-side random forest (reference is explicitly CPU/numpy, non-differentiable)
# TODO(synk): real NRQM uses pretrained random-forest / linear weights from
#             NRQM_model.mat; deterministic random stand-ins are used here.
# -----------------------------------------------------------------------------
def make_rf_params(dim, seed, depth=4, tree_num=4):
    rng = np.random.RandomState(seed)
    n_internal = 2 ** depth - 1
    node_num = 2 ** (depth + 1) - 1
    ldau = np.zeros((node_num, tree_num), np.int64)
    rdau = np.zeros((node_num, tree_num), np.int64)
    for kk in range(n_internal):
        ldau[kk, :] = 2 * kk + 2
        rdau[kk, :] = 2 * kk + 3
    thr = rng.randn(node_num, tree_num).astype(np.float32)
    pred = rng.randn(node_num, tree_num).astype(np.float32)
    attr = rng.randint(1, dim + 1, size=(node_num, tree_num)).astype(np.int64)
    return ldau, rdau, thr, pred, attr


def tree_regression(feat, ldau, rdau, thr, pred, attr):
    prev_k = k = 0
    for _ in range(ldau.shape[0]):
        best_col = attr[k] - 1
        threshold = thr[k]
        key_value = feat[best_col]
        prev_k = k
        k = ldau[k] - 1 if key_value <= threshold else rdau[k] - 1
        if k == -1:
            break
    return pred[prev_k]


def random_forest_regression(feat, ldau, rdau, thr, pred, attr):
    feat = np.asarray(feat)
    b, _ = feat.shape
    _, tree_num = ldau.shape
    out = []
    for i in range(b):
        out.append([tree_regression(feat[i], ldau[:, t], rdau[:, t], thr[:, t],
                                    pred[:, t], attr[:, t]) for t in range(tree_num)])
    out = np.array(out, np.float32)
    return jnp.asarray(out.mean(axis=1, keepdims=True))


# -----------------------------------------------------------------------------
# full forward
# -----------------------------------------------------------------------------
def nrqm_forward(img):
    """img: (B, C, H, W), gray / Y channel, values in [0, 255]."""
    B = img.shape[0]
    img = img.astype(jnp.float32)
    # (test_y_channel conversion is a no-op for single-channel inputs; crop_border=0)
    x = img / 255.0

    # gaussian pyramid (fused blur + decimation kernels)
    pyr = [x]
    for _ in range(2):
        x = gauss_pyr_down_pallas(x)
        pyr.append(x)

    gamma_tab = jnp.asarray(_GAMMA_TAB_F32)
    mid_asc = jnp.asarray(_MID_ASC)

    # f1: local frequency (block DCT) features
    f1 = jnp.concatenate([block_dct_feat(im, gamma_tab, mid_asc) for im in pyr], axis=1)

    # TODO(synk): f2 = global_gsm(img) (complex steerable pyramid via FFT, eigh,
    # lstsq whitening, SSIM) has no clean Pallas equivalent and is omitted.

    # f3: singular values of distinct 5x5 patch matrices (SVD stays in XLA glue)
    f3 = jnp.concatenate(
        [jnp.linalg.svd(im2col_distinct(im, 5), compute_uv=False) for im in pyr],
        axis=1)

    f1_np = np.asarray(jax.device_get(f1))
    f3_np = np.asarray(jax.device_get(f3))

    rf1 = make_rf_params(f1_np.shape[1], seed=1)
    rf3 = make_rf_params(f3_np.shape[1], seed=3)
    pred1 = random_forest_regression(f1_np, *rf1)
    pred3 = random_forest_regression(f3_np, *rf3)

    preds = jnp.concatenate([jnp.ones((B, 1), jnp.float32), pred1, pred3], axis=1)
    linear_param = jnp.asarray(
        np.random.RandomState(0).randn(3, 1).astype(np.float32))
    quality = (preds @ linear_param).squeeze()
    return quality


if __name__ == "__main__":
    key = jax.random.PRNGKey(0)
    x = jax.random.uniform(key, (2, 1, 32, 32), jnp.float32, 0.0, 255.0)
    score = nrqm_forward(x)
    score = jax.block_until_ready(score)
    assert score.shape == (2,)
    assert bool(jnp.all(jnp.isfinite(score)))
    print("KERNEL_OK")
</pallas_src>

<mosaic_0001>
module attributes {stable_mosaic.version = 11 : i64} {
  func.func @_gauss_down_kernel(%arg0: i32, %arg1: memref<48x128xf32, #tpu.memory_space<vmem>>, %arg2: memref<48x128xf32, #tpu.memory_space<vmem>>, %arg3: memref<48x128xf32, #tpu.memory_space<vmem>>, %arg4: memref<48x128xf32, #tpu.memory_space<vmem>>, %arg5: memref<48x128xf32, #tpu.memory_space<vmem>>) attributes {dimension_semantics = [#tpu.dimension_semantics<parallel>], iteration_bounds = array<i64: 1>, scalar_prefetch = 0 : i64, scratch_operands = 0 : i64, tpu.core_type = #tpu.core_type<tc>, window_params = [{transform_indices = @transform_0, window_bounds = array<i64: 48, 128>}, {transform_indices = @transform_1, window_bounds = array<i64: 48, 128>}, {transform_indices = @transform_2, window_bounds = array<i64: 48, 128>}, {transform_indices = @transform_3, window_bounds = array<i64: 48, 128>}, {transform_indices = @transform_4, window_bounds = array<i64: 48, 128>}]} {
    %c0 = arith.constant 0 : index
    %c0_0 = arith.constant 0 : index
    %0 = vector.load %arg1[%c0, %c0_0] : memref<48x128xf32, #tpu.memory_space<vmem>>, vector<48x128xf32>
    %c0_1 = arith.constant 0 : index
    %c0_2 = arith.constant 0 : index
    %1 = vector.load %arg2[%c0_1, %c0_2] : memref<48x128xf32, #tpu.memory_space<vmem>>, vector<48x128xf32>
    %c0_3 = arith.constant 0 : index
    %c0_4 = arith.constant 0 : index
    %2 = vector.load %arg3[%c0_3, %c0_4] : memref<48x128xf32, #tpu.memory_space<vmem>>, vector<48x128xf32>
    %c0_5 = arith.constant 0 : index
    %c0_6 = arith.constant 0 : index
    %3 = vector.load %arg4[%c0_5, %c0_6] : memref<48x128xf32, #tpu.memory_space<vmem>>, vector<48x128xf32>
    %c127_i32 = arith.constant 127 : i32
    %4 = tpu.dynamic_rotate %0 by %c127_i32 dim 1 : vector<48x128xf32>, i32 -> vector<48x128xf32>
    %c127_i32_7 = arith.constant 127 : i32
    %5 = tpu.dynamic_rotate %2 by %c127_i32_7 dim 1 : vector<48x128xf32>, i32 -> vector<48x128xf32>
    %c47_i32 = arith.constant 47 : i32
    %6 = tpu.dynamic_rotate %0 by %c47_i32 dim 0 : vector<48x128xf32>, i32 -> vector<48x128xf32>
    %c47_i32_8 = arith.constant 47 : i32
    %7 = tpu.dynamic_rotate %1 by %c47_i32_8 dim 0 : vector<48x128xf32>, i32 -> vector<48x128xf32>
    %c127_i32_9 = arith.constant 127 : i32
    %8 = tpu.dynamic_rotate %6 by %c127_i32_9 dim 1 : vector<48x128xf32>, i32 -> vector<48x128xf32>
    %9 = arith.addf %0, %4 : vector<48x128xf32>
    %10 = arith.addf %6, %8 : vector<48x128xf32>
    %11 = arith.addf %9, %10 : vector<48x128xf32>
    %cst = arith.constant 0.0113437362 : f32
    %12 = vector.broadcast %cst : f32 to vector<48x128xf32>
    %13 = arith.mulf %12, %11 : vector<48x128xf32>
    %14 = arith.addf %1, %2 : vector<48x128xf32>
    %15 = arith.addf %5, %7 : vector<48x128xf32>
    %16 = arith.addf %14, %15 : vector<48x128xf32>
    %cst_10 = arith.constant 0.0838195086 : f32
    %17 = vector.broadcast %cst_10 : f32 to vector<48x128xf32>
    %18 = arith.mulf %17, %16 : vector<48x128xf32>
    %19 = arith.addf %13, %18 : vector<48x128xf32>
    %cst_11 = arith.constant 0.619347035 : f32
    %20 = vector.broadcast %cst_11 : f32 to vector<48x128xf32>
    %21 = arith.mulf %20, %3 : vector<48x128xf32>
    %22 = arith.addf %19, %21 : vector<48x128xf32>
    %c0_12 = arith.constant 0 : index
    %c0_13 = arith.constant 0 : index
    %23 = vector.load %arg5[%c0_12, %c0_13] : memref<48x128xf32, #tpu.memory_space<vmem>>, vector<48x128xf32>
    tpu.vector_store %arg5[%c0_12, %c0_13], %22 {strides = array<i32>} : memref<48x128xf32, #tpu.memory_space<vmem>>, vector<48x128xf32>,
    return
  }
  func.func @transform_0(%arg0: i32) -> (i32, i32) {
    %c0_i32 = arith.constant 0 : i32
    %c0_i32_0 = arith.constant 0 : i32
    return %arg0, %c0_i32 : i32, i32
  }
  func.func @transform_1(%arg0: i32) -> (i32, i32) {
    %c0_i32 = arith.constant 0 : i32
    %c0_i32_0 = arith.constant 0 : i32
    return %arg0, %c0_i32 : i32, i32
  }
  func.func @transform_2(%arg0: i32) -> (i32, i32) {
    %c0_i32 = arith.constant 0 : i32
    %c0_i32_0 = arith.constant 0 : i32
    return %arg0, %c0_i32 : i32, i32
  }
  func.func @transform_3(%arg0: i32) -> (i32, i32) {
    %c0_i32 = arith.constant 0 : i32
    %c0_i32_0 = arith.constant 0 : i32
    return %arg0, %c0_i32 : i32, i32
  }
  func.func @transform_4(%arg0: i32) -> (i32, i32) {
    %c0_i32 = arith.constant 0 : i32
    %c0_i32_0 = arith.constant 0 : i32
    return %arg0, %c0_i32 : i32, i32
  }
}

</mosaic_0001>

<bundles_post_ra>
// kernel: tpu_custom_call.1
= control target key start
LH: loop header
LB: loop body
LE: loop exit
PB: predicated region body
PF: predicated region fallthrough
CT: control target
= control target key end

     0   :  { %9 = vsyncpa [#allocation3], 0  ;;  %s535_s0 = inlined_call_operand.hbm [shape: f32[48,128], index: 0, kind: input, shape index: {}]   ;;  %s536_s1 = inlined_call_operand.hbm [shape: f32[48,128], index: 1, kind: input, shape index: {}]   ;;  %s537_s2 = inlined_call_operand.hbm [shape: f32[48,128], index: 2, kind: input, shape index: {}]   ;;  %s538_s3 = inlined_call_operand.hbm [shape: f32[48,128], index: 3, kind: input, shape index: {}]   ;;  %s539_s4 = inlined_call_operand.hbm [shape: f32[48,128], index: 4, kind: output, shape index: {}]  }
   0x1   :  { %10 = vsyncpa [#allocation6], 0 }
   0x2   :  { %11 = vsyncpa [#allocation9], 0 }
   0x3   :  { %12 = vsyncpa [#allocation4], 0  ;;  %s367_s15 = smov [#allocation5]   ;;  %s368_s17 = smov [#allocation2]  }
   0x4   :  { %s30_s16 = sshll.u32 %s367_s15, 4  ;;  %s18_s18 = sshll.u32 %s368_s17, 4  ;;  %s31_s16 = int_to_ptr.vmem [resolvable:$true] %s30_s16  ;;  %s19_s18 = int_to_ptr.vmem [resolvable:$true] %s18_s18 }
   0x5   :  { %s267_s19 = scalar_lea.vmem %s31_s16, 768  ;;  %p272_p1 = scmp.lt.s32.totalorder %s31_s16, %s31_s16 }
   0x6   :  { %p268_p0 = scmp.ne.s32.totalorder %s31_s16, %s267_s19  ;;  %p273_p2 = scmp.lt.s32.totalorder %s267_s19, %s267_s19 }
   0x8   :  { %p274_p3 = por %p273_p2, %p272_p1 }
   0xa   :  { %p275_p4 = pnand %p274_p3, %p268_p0 }
   0xc   :  { %278 = shalt.err (!%p275_p4)
}
   0xd   :  { %s369_s20 = smov 128   ;;  %s370_s21 = smov 8  }
   0xe   :  { %36 = dma.hbm_to_vmem [thread:$0]  %s536_s1, 768, %s31_s16, [#allocation6], %s369_s20, %s369_s20, %s370_s21  }
   0xf   :  { %s287_s24 = scalar_lea.vmem %s19_s18, 768  ;;  %p292_p6 = scmp.lt.s32.totalorder %s19_s18, %s19_s18 }
  0x10   :  { %p288_p5 = scmp.ne.s32.totalorder %s19_s18, %s287_s24  ;;  %p293_p7 = scmp.lt.s32.totalorder %s287_s24, %s287_s24 }
  0x12   :  { %p294_p8 = por %p293_p7, %p292_p6 }
  0x14   :  { %p295_p9 = pnand %p294_p8, %p288_p5 }
  0x16   :  { %298 = shalt.err (!%p295_p9)
}
  0x17   :  { %24 = dma.hbm_to_vmem [thread:$0]  %s535_s0, 768, %s19_s18, [#allocation3], %s369_s20, %s369_s20, %s370_s21  }
  0x18   :  { %s371_s27 = smov [#allocation7]   ;;  %s372_s29 = smov [#allocation8]  }
  0x19   :  { %s42_s28 = sshll.u32 %s371_s27, 4  ;;  %s54_s30 = sshll.u32 %s372_s29, 4  ;;  %s43_s28 = int_to_ptr.vmem [resolvable:$true] %s42_s28  ;;  %s55_s30 = int_to_ptr.vmem [resolvable:$true] %s54_s30 }
  0x1a   :  { %s307_s1 = scalar_lea.vmem %s43_s28, 768  ;;  %p312_p11 = scmp.lt.s32.totalorder %s43_s28, %s43_s28 }
  0x1b   :  { %p308_p10 = scmp.ne.s32.totalorder %s43_s28, %s307_s1  ;;  %p313_p12 = scmp.lt.s32.totalorder %s307_s1, %s307_s1 }
  0x1d   :  { %p314_p13 = por %p313_p12, %p312_p11 }
  0x1f   :  { %p315_p0 = pnand %p314_p13, %p308_p10 }
  0x21   :  { %318 = shalt.err (!%p315_p0)
}
  0x22   :  { %48 = dma.hbm_to_vmem [thread:$0]  %s537_s2, 768, %s43_s28, [#allocation6], %s369_s20, %s369_s20, %s370_s21  }
  0x23   :  { %s327_s0 = scalar_lea.vmem %s55_s30, 768  ;;  %p332_p2 = scmp.lt.s32.totalorder %s55_s30, %s55_s30 }
  0x24   :  { %p328_p1 = scmp.ne.s32.totalorder %s55_s30, %s327_s0  ;;  %p333_p3 = scmp.lt.s32.totalorder %s327_s0, %s327_s0 }
  0x26   :  { %p334_p4 = por %p333_p3, %p332_p2 }
  0x28   :  { %p335_p5 = pnand %p334_p4, %p328_p1 }
  0x2a   :  { %338 = shalt.err (!%p335_p5)
}
  0x2b   :  { %60 = dma.hbm_to_vmem [thread:$0]  %s538_s3, 768, %s55_s30, [#allocation9], %s369_s20, %s369_s20, %s370_s21  }
  0x2c   :  { %359 = dma.done.wait [#allocation3], 768  }
  0x2d   :  { %360 = vsyncadd [#allocation3], 4294966528 }
  0x2e   :  { %361 = dma.done.wait [#allocation6], 1536  }
  0x2f   :  { %362 = vsyncadd [#allocation6], 4294965760 }
  0x30   :  { %363 = dma.done.wait [#allocation9], 768  }
  0x31   :  { %364 = vsyncadd [#allocation9], 4294966528  ;;  %v424_v0 = vld [vmem:[#allocation2 + $0x10] sm:$0xff]  ;;  %v426_v1 = vld [vmem:[#allocation2] sm:$0xff]  ;;  %s373_s2 = smov 127   ;;  %v127_v8 = vlaneseq  ;;  %s374_s3 = smov [#allocation10]  }
  0x32   :  { %101 = vrot.lane.b32.xlu1 %v424_v0, %s373_s2  ;;  %97 = vrot.lane.b32.xlu0 %v426_v1, %s373_s2  ;;  %v432_v2 = vld [vmem:[#allocation2 + $0x18] sm:$0xff]  ;;  %v434_v3 = vld [vmem:[#allocation2 + $0x8] sm:$0xff]  ;;  %v442_v5 = vld [vmem:[#allocation2 + $0x20] sm:$0xff]  ;;  %v123_v12 = vrot.slane %v424_v0, 1  ;;  %v121_v13 = vrot.slane %v426_v1, 1  ;;  %s237_s9 = sshll.u32 %s374_s3, 4  ;;  %s238_s9 = int_to_ptr.vmem [resolvable:$true] %s237_s9 }
  0x33   :  { %v440_v4 = vld [vmem:[#allocation2 + $0x28] sm:$0xff]  ;;  %v85_v7 = vld [vmem:[#allocation7] sm:$0xff]  ;;  %v88_v9 = vld [vmem:[#allocation7 + $0x18] sm:$0xff]  ;;  %v450_v11 = vshrl.u32 %v127_v8, 7  ;;  %v122_v14 = vrot.slane %v434_v3, 1  ;;  %v124_v17 = vrot.slane %v432_v2, 1  ;;  %p344_p7 = scmp.lt.s32.totalorder %s238_s9, %s238_s9 }
  0x34   :  { %v86_v6 = vld [vmem:[#allocation7 + $0x8] sm:$0xff]  ;;  %v87_v10 = vld [vmem:[#allocation7 + $0x10] sm:$0xff]  ;;  %v89_v16 = vld [vmem:[#allocation7 + $0x20] sm:$0xff]  ;;  %v125_v18 = vrot.slane %v442_v5, 1  ;;  %v126_v21 = vrot.slane %v440_v4, 1  ;;  %s339_s10 = scalar_lea.vmem %s238_s9, 768 }
  0x35   :  { %v90_v15 = vld [vmem:[#allocation7 + $0x28] sm:$0xff]  ;;  %vm129_vm0 = vcmp.lt.s32.totalorder %v450_v11, 7  ;;  %v80_v28 = vld [vmem:[#allocation5 + $0x8] sm:$0xff]  ;;  %v79_v29 = vld [vmem:[#allocation5] sm:$0xff]  ;;  %p340_p6 = scmp.ne.s32.totalorder %s238_s9, %s339_s10  ;;  %p345_p8 = scmp.lt.s32.totalorder %s339_s10, %s339_s10 }
  0x36   :  { %103 = vrot.lane.b32.xlu1 %v432_v2, %s373_s2  ;;  %99 = vrot.lane.b32.xlu0 %v434_v3, %s373_s2  ;;  %v464_v19 = vsel %vm129_vm0, %v122_v14, %v123_v12  ;;  %v468_v20 = vsel %vm129_vm0, %v121_v13, %v122_v14  ;;  %v477_v22 = vsel %vm129_vm0, %v124_v17, %v125_v18  ;;  %v81_v30 = vld [vmem:[#allocation5 + $0x10] sm:$0xff]  ;;  %v137_v33 = vrot.slane %v80_v28, 1  ;;  %v82_v36 = vld [vmem:[#allocation5 + $0x18] sm:$0xff]  ;;  %v83_v37 = vld [vmem:[#allocation5 + $0x20] sm:$0xff] }
  0x37   :  { %v481_v23 = vsel %vm129_vm0, %v123_v12, %v124_v17  ;;  %v489_v24 = vsel %vm129_vm0, %v126_v21, %v121_v13  ;;  %v493_v25 = vsel %vm129_vm0, %v125_v18, %v126_v21  ;;  %v136_v34 = vrot.slane %v79_v29, 1  ;;  %v84_v46 = vld [vmem:[#allocation5 + $0x28] sm:$0xff]  ;;  %p346_p9 = por %p345_p8, %p344_p7 }
  0x38   :  { %v138_v35 = vrot.slane %v81_v30, 1  ;;  %v139_v40 = vrot.slane %v82_v36, 1  ;;  %v140_v41 = vrot.slane %v83_v37, 1  ;;  %v185_v44 = vadd.f32 %v86_v6, %v80_v28  ;;  %v92_v21 = vld [vmem:[#allocation8 + $0x8] sm:$0xff] }
  0x39   :  { %v146_v43 = vsel %vm129_vm0, %v136_v34, %v137_v33  ;;  %v184_v45 = vadd.f32 %v85_v7, %v79_v29  ;;  %v141_v51 = vrot.slane %v84_v46, 1  ;;  %v187_v54 = vadd.f32 %v88_v9, %v82_v36  ;;  %v91_v29 = vld [vmem:[#allocation8] sm:$0xff]  ;;  %p347_p10 = pnand %p346_p9, %p340_p6 }
  0x3a   :  { %107 = vrot.lane.b32.xlu1 %v440_v4, %s373_s2  ;;  %105 = vrot.lane.b32.xlu0 %v442_v5, %s373_s2  ;;  %v145_v42 = vsel %vm129_vm0, %v137_v33, %v138_v35  ;;  %v143_v52 = vsel %vm129_vm0, %v139_v40, %v140_v41  ;;  %v144_v53 = vsel %vm129_vm0, %v138_v35, %v139_v40  ;;  %v214_v36 = vmul.f32 0.61934704, %v91_v29  ;;  %v94_v40 = vld [vmem:[#allocation8 + $0x18] sm:$0xff] }
  0x3b   :  { %v186_v55 = vadd.f32 %v87_v10, %v81_v30  ;;  %v147_v62 = vsel %vm129_vm0, %v141_v51, %v136_v34  ;;  %v142_v63 = vsel %vm129_vm0, %v140_v41, %v141_v51 }
  0x3e   :  { %111 = vrot.lane.b32.xlu1 %v86_v6, %s373_s2  ;;  %109 = vrot.lane.b32.xlu0 %v85_v7, %s373_s2  ;;  %v189_v6 = vadd.f32 %v90_v15, %v84_v46  ;;  %v188_v7 = vadd.f32 %v89_v16, %v83_v37 }
  0x42   :  { %115 = vrot.lane.b32.xlu1 %v88_v9, %s373_s2  ;;  %113 = vrot.lane.b32.xlu0 %v87_v10, %s373_s2 }
  0x46   :  { %119 = vrot.lane.b32.xlu1 %v90_v15, %s373_s2  ;;  %117 = vrot.lane.b32.xlu0 %v89_v16, %s373_s2  ;;  %v215_v16 = vmul.f32 0.61934704, %v92_v21 }
  0x4a   :  { %150 = vrot.lane.b32.xlu1 %v464_v19, %s373_s2  ;;  %148 = vrot.lane.b32.xlu0 %v468_v20, %s373_s2 }
  0x4e   :  { %154 = vrot.lane.b32.xlu1 %v477_v22, %s373_s2  ;;  %152 = vrot.lane.b32.xlu0 %v481_v23, %s373_s2 }
  0x52   :  { %158 = vrot.lane.b32.xlu1 %v489_v24, %s373_s2  ;;  %156 = vrot.lane.b32.xlu0 %v493_v25, %s373_s2 }
  0xa4   :  { %v102_v26 = vpop.permute.xlu1 %101  ;;  %v98_v27 = vpop.permute.xlu0 %97 }
  0xa5   :  { %v160_v33 = vadd.f32 %v98_v27, %v426_v1  ;;  %v162_v41 = vadd.f32 %v102_v26, %v424_v0 }
  0xa8   :  { %v104_v31 = vpop.permute.xlu1 %103  ;;  %v100_v32 = vpop.permute.xlu0 %99 }
  0xa9   :  { %v161_v34 = vadd.f32 %v100_v32, %v434_v3  ;;  %v217_v32 = vmul.f32 0.61934704, %v94_v40 }
  0xac   :  { %v499_v38 = vpop.permute.xlu1 %107  ;;  %v501_v39 = vpop.permute.xlu0 %105 }
  0xb0   :  { %v112_v47 = vpop.permute.xlu1 %111  ;;  %v110_v48 = vpop.permute.xlu0 %109 }
  0xb1   :  { %v191_v49 = vadd.f32 %v145_v42, %v112_v47  ;;  %v190_v50 = vadd.f32 %v146_v43, %v110_v48  ;;  %v163_v42 = vadd.f32 %v104_v31, %v432_v2 }
  0xb3   :  { %v197_v56 = vadd.f32 %v191_v49, %v185_v44  ;;  %v196_v57 = vadd.f32 %v190_v50, %v184_v45 }
  0xb4   :  { %v116_v58 = vpop.permute.xlu1 %115  ;;  %v114_v59 = vpop.permute.xlu0 %113 }
  0xb5   :  { %v193_v60 = vadd.f32 %v143_v52, %v116_v58  ;;  %v192_v61 = vadd.f32 %v144_v53, %v114_v59  ;;  %v203_v43 = vmul.f32 0.08381951, %v197_v56  ;;  %v202_v44 = vmul.f32 0.08381951, %v196_v57  ;;  %v96_v56 = vld [vmem:[#allocation8 + $0x28] sm:$0xff]  ;;  %v95_v58 = vld [vmem:[#allocation8 + $0x20] sm:$0xff] }
  0xb7   :  { %v199_v8 = vadd.f32 %v193_v60, %v187_v54  ;;  %v198_v12 = vadd.f32 %v192_v61, %v186_v55 }
  0xb8   :  { %v120_v13 = vpop.permute.xlu1 %119  ;;  %v118_v14 = vpop.permute.xlu0 %117 }
  0xb9   :  { %v195_v9 = vadd.f32 %v147_v62, %v120_v13  ;;  %v194_v10 = vadd.f32 %v142_v63, %v118_v14  ;;  %v205_v51 = vmul.f32 0.08381951, %v199_v8  ;;  %v204_v0 = vmul.f32 0.08381951, %v198_v12 }
  0xba   :  { %v219_v62 = vmul.f32 0.61934704, %v96_v56  ;;  %v218_v13 = vmul.f32 0.61934704, %v95_v58 }
  0xbb   :  { %v201_v17 = vadd.f32 %v195_v9, %v189_v6  ;;  %v200_v18 = vadd.f32 %v194_v10, %v188_v7 }
  0xbc   :  { %v151_v28 = vpop.permute.xlu1 %150  ;;  %v149_v30 = vpop.permute.xlu0 %148 }
  0xbd   :  { %v167_v11 = vadd.f32 %v151_v28, %v464_v19  ;;  %v166_v15 = vadd.f32 %v149_v30, %v468_v20  ;;  %v93_v19 = vld [vmem:[#allocation8 + $0x10] sm:$0xff]  ;;  %v207_v7 = vmul.f32 0.08381951, %v201_v17 }
  0xbe   :  { %v216_v26 = vmul.f32 0.61934704, %v93_v19 }
  0xbf   :  { %v173_v35 = vadd.f32 %v167_v11, %v161_v34  ;;  %v172_v37 = vadd.f32 %v166_v15, %v160_v33 }
  0xc0   :  { %v155_v45 = vpop.permute.xlu1 %154  ;;  %v153_v46 = vpop.permute.xlu0 %152 }
  0xc1   :  { %v179_v1 = vmul.f32 0.011343736, %v173_v35  ;;  %v178_v27 = vmul.f32 0.011343736, %v172_v37  ;;  %v169_v3 = vadd.f32 %v155_v45, %v477_v22  ;;  %v168_v20 = vadd.f32 %v153_v46, %v481_v23 }
  0xc2   :  { %v165_v22 = vadd.f32 %v499_v38, %v440_v4  ;;  %v164_v23 = vadd.f32 %v501_v39, %v442_v5  ;;  %v206_v4 = vmul.f32 0.08381951, %v200_v18 }
  0xc3   :  { %v209_v47 = vadd.f32 %v203_v43, %v179_v1  ;;  %v208_v48 = vadd.f32 %v202_v44, %v178_v27  ;;  %v175_v49 = vadd.f32 %v169_v3, %v163_v42  ;;  %v174_v50 = vadd.f32 %v168_v20, %v162_v41 }
  0xc4   :  { %v159_v2 = vpop.permute.xlu1 %158  ;;  %v157_v31 = vpop.permute.xlu0 %156 }
  0xc5   :  { %v221_v52 = vadd.f32 %v215_v16, %v209_v47  ;;  %v220_v53 = vadd.f32 %v214_v36, %v208_v48  ;;  %v181_v54 = vmul.f32 0.011343736, %v175_v49  ;;  %v180_v55 = vmul.f32 0.011343736, %v174_v50 }
  0xc6   :  { %v171_v57 = vadd.f32 %v159_v2, %v489_v24  ;;  %v170_v59 = vadd.f32 %v157_v31, %v493_v25 }
  0xc7   :  { %227 = vst [vmem:[#allocation10 + $0x8] sm:$0xff] %v221_v52  ;;  %226 = vst [vmem:[#allocation10] sm:$0xff] %v220_v53  ;;  %v211_v60 = vadd.f32 %v205_v51, %v181_v54  ;;  %v210_v61 = vadd.f32 %v204_v0, %v180_v55 }
  0xc8   :  { %v177_v63 = vadd.f32 %v171_v57, %v165_v22  ;;  %v176_v6 = vadd.f32 %v170_v59, %v164_v23 }
  0xc9   :  { %v223_v8 = vadd.f32 %v217_v32, %v211_v60  ;;  %v222_v12 = vadd.f32 %v216_v26, %v210_v61 }
  0xca   :  { %v183_v38 = vmul.f32 0.011343736, %v177_v63  ;;  %v182_v14 = vmul.f32 0.011343736, %v176_v6 }
  0xcb   :  { %229 = vst [vmem:[#allocation10 + $0x18] sm:$0xff] %v223_v8  ;;  %228 = vst [vmem:[#allocation10 + $0x10] sm:$0xff] %v222_v12 }
  0xcc   :  { %v213_v5 = vadd.f32 %v207_v7, %v183_v38  ;;  %v212_v24 = vadd.f32 %v206_v4, %v182_v14 }
  0xce   :  { %v225_v25 = vadd.f32 %v219_v62, %v213_v5  ;;  %v224_v39 = vadd.f32 %v218_v13, %v212_v24 }
  0xd0   :  { %231 = vst [vmem:[#allocation10 + $0x28] sm:$0xff] %v225_v25  ;;  %230 = vst [vmem:[#allocation10 + $0x20] sm:$0xff] %v224_v39 }
  0xd1   :  { %350 = shalt.err (!%p347_p10)
}
  0xd2   :  { %243 = dma.vmem_to_hbm [thread:$0]  %s238_s9, 768, %s539_s4, [#allocation4], %s369_s20, %s369_s20, %s370_s21  }
  0xd3   :  { %365 = dma.done.wait [#allocation4], 768  }
  0xd4   :  { %366 = vsyncadd [#allocation4], 4294966528 }
  0xd5   :  { %247 = vsyncpa [#allocation3], 1 }
  0xd6   :  { %248 = vsyncpa [#allocation6], 1 }
  0xd7   :  { %249 = vsyncpa [#allocation9], 1 }
  0xd8   :  { %250 = vsyncpa [#allocation4], 1 }

</bundles_post_ra>
